<compile_context>
chip_gen: v7x
topology: tpu7x:2x2x1
jax: 0.10.0
libtpu: 0.0.40
codegen_flags: <defaults>
</compile_context>

<pallas_src>
import jax
import jax.numpy as jnp
from jax.experimental import pallas as pl
from jax.experimental.pallas import tpu as pltpu

_MAX_CHUNKS = 8                   # DMA parallelism for large copies
_CHUNK_BYTES_THRESHOLD = 1 << 20  # below ~1 MiB a single DMA is plenty


def _make_dma_copy_kernel(chunks):
    """Build a kernel issuing one HBM->HBM DMA per static (start, size) chunk."""

    def kernel(x_hbm, o_hbm, sem):
        copies = []
        for i, (start, size) in enumerate(chunks):
            cp = pltpu.make_async_copy(
                x_hbm.at[pl.ds(start, size)],
                o_hbm.at[pl.ds(start, size)],
                sem.at[i],
            )
            cp.start()
            copies.append(cp)
        for cp in copies:
            cp.wait()

    return kernel


def _chunk_leading_axis(lead, total_bytes):
    """Static (start, size) chunks of the leading axis for DMA overlap."""
    if total_bytes < _CHUNK_BYTES_THRESHOLD or lead <= 1:
        return ((0, lead),)
    n = min(_MAX_CHUNKS, lead)
    base, rem = divmod(lead, n)
    chunks = []
    start = 0
    for i in range(n):
        size = base + (1 if i < rem else 0)
        if size > 0:
            chunks.append((start, size))
            start += size
    return tuple(chunks)


def identity(x, *, donate_input: bool = False):
    """Pallas identity: y = x, exact shape/dtype preserved.

    donate_input=True means the caller does not require a distinct output
    buffer; nn.Identity semantics are then a pure pass-through at zero cost.
    Otherwise the copy is done as a direct HBM->HBM DMA.
    """
    if donate_input or x.size == 0:
        return x

    orig_shape = x.shape
    xv = x if x.ndim >= 1 else x.reshape(1)  # 0-d -> (1,), layout-neutral
    lead = xv.shape[0]
    total_bytes = int(xv.size) * jnp.dtype(xv.dtype).itemsize
    chunks = _chunk_leading_axis(lead, total_bytes)

    y = pl.pallas_call(
        _make_dma_copy_kernel(chunks),
        out_shape=jax.ShapeDtypeStruct(xv.shape, xv.dtype),
        in_specs=[pl.BlockSpec(memory_space=pl.ANY)],
        out_specs=pl.BlockSpec(memory_space=pl.ANY),
        scratch_shapes=[pltpu.SemaphoreType.DMA((len(chunks),))],
    )(xv)

    return y if y.shape == orig_shape else y.reshape(orig_shape)


if __name__ == "__main__":
    key = jax.random.PRNGKey(0)

    # Small NCHW feature-map input (last dim NOT a multiple of 128):
    # exercises the shape-agnostic single-DMA path with zero relayout.
    x = jax.random.normal(key, (2, 4, 16, 16), dtype=jnp.float32)
    y = identity(x)
    jax.block_until_ready(y)
    assert y.shape == x.shape and y.dtype == x.dtype
    assert bool(jnp.all(y == x))

    # Donated / pass-through case: true no-op (no kernel at all).
    y_d = identity(x, donate_input=True)
    assert y_d is x

    # Larger lane-dense tensor (2 MiB): exercises the 8-chunk overlapped DMA path.
    k2 = jax.random.fold_in(key, 1)
    x2 = jax.random.normal(k2, (8, 16, 32, 128), dtype=jnp.float32)
    y2 = identity(x2)
    jax.block_until_ready(y2)
    assert y2.shape == x2.shape and y2.dtype == x2.dtype
    assert bool(jnp.all(y2 == x2))

    # Odd, unaligned shape and a narrow dtype: DMA path needs no (8,128) care.
    k3 = jax.random.fold_in(key, 2)
    x3 = jax.random.normal(k3, (3, 5, 7), dtype=jnp.bfloat16)
    y3 = identity(x3)
    jax.block_until_ready(y3)
    assert y3.shape == x3.shape and y3.dtype == x3.dtype
    assert bool(jnp.all(y3 == x3))

    print("KERNEL_OK")
</pallas_src>

<mosaic_0001>
module attributes {stable_mosaic.version = 11 : i64} {
  func.func @kernel(%arg0: memref<2x4x16x16xf32, #tpu.memory_space<any>>, %arg1: memref<2x4x16x16xf32, #tpu.memory_space<any>>, %arg2: memref<1x!tpu.dma_semaphore, #tpu.memory_space<semaphore_mem>>) attributes {dimension_semantics = [], scalar_prefetch = 0 : i64, scratch_operands = 1 : i64, tpu.core_type = #tpu.core_type<tc>} {
    %c0_i32 = arith.constant 0 : i32
    %c0_i32_0 = arith.constant 0 : i32
    %c0_i32_1 = arith.constant 0 : i32
    %c0_i32_2 = arith.constant 0 : i32
    %c0_i32_3 = arith.constant 0 : i32
    %0 = tpu.memref_slice %arg0[%c0_i32_0, %c0_i32_1, %c0_i32_2, %c0_i32_3] : memref<2x4x16x16xf32, #tpu.memory_space<any>> -> memref<2x4x16x16xf32, #tpu.memory_space<any>>
    %c0_i32_4 = arith.constant 0 : i32
    %c0_i32_5 = arith.constant 0 : i32
    %c0_i32_6 = arith.constant 0 : i32
    %c0_i32_7 = arith.constant 0 : i32
    %1 = tpu.memref_slice %arg1[%c0_i32_4, %c0_i32_5, %c0_i32_6, %c0_i32_7] : memref<2x4x16x16xf32, #tpu.memory_space<any>> -> memref<2x4x16x16xf32, #tpu.memory_space<any>>
    %2 = tpu.memref_slice %arg2[%c0_i32] : memref<1x!tpu.dma_semaphore, #tpu.memory_space<semaphore_mem>> -> memref<1x!tpu.dma_semaphore, #tpu.memory_space<semaphore_mem>>
    %3 = tpu.memref_squeeze %2 : memref<1x!tpu.dma_semaphore, #tpu.memory_space<semaphore_mem>> -> memref<!tpu.dma_semaphore, #tpu.memory_space<semaphore_mem>>
    tpu.enqueue_dma source(%0 : memref<2x4x16x16xf32, #tpu.memory_space<any>>) target(%1 : memref<2x4x16x16xf32, #tpu.memory_space<any>>) target_semaphore(%3 : memref<!tpu.dma_semaphore, #tpu.memory_space<semaphore_mem>>)
    %c0_i32_8 = arith.constant 0 : i32
    %c0_i32_9 = arith.constant 0 : i32
    %c0_i32_10 = arith.constant 0 : i32
    %c0_i32_11 = arith.constant 0 : i32
    %c0_i32_12 = arith.constant 0 : i32
    %4 = tpu.memref_slice %arg0[%c0_i32_9, %c0_i32_10, %c0_i32_11, %c0_i32_12] : memref<2x4x16x16xf32, #tpu.memory_space<any>> -> memref<2x4x16x16xf32, #tpu.memory_space<any>>
    %c0_i32_13 = arith.constant 0 : i32
    %c0_i32_14 = arith.constant 0 : i32
    %c0_i32_15 = arith.constant 0 : i32
    %c0_i32_16 = arith.constant 0 : i32
    %5 = tpu.memref_slice %arg1[%c0_i32_13, %c0_i32_14, %c0_i32_15, %c0_i32_16] : memref<2x4x16x16xf32, #tpu.memory_space<any>> -> memref<2x4x16x16xf32, #tpu.memory_space<any>>
    %6 = tpu.memref_slice %arg2[%c0_i32_8] : memref<1x!tpu.dma_semaphore, #tpu.memory_space<semaphore_mem>> -> memref<1x!tpu.dma_semaphore, #tpu.memory_space<semaphore_mem>>
    %7 = tpu.memref_squeeze %6 : memref<1x!tpu.dma_semaphore, #tpu.memory_space<semaphore_mem>> -> memref<!tpu.dma_semaphore, #tpu.memory_space<semaphore_mem>>
    tpu.wait_dma2 semaphore(%7 : memref<!tpu.dma_semaphore, #tpu.memory_space<semaphore_mem>>) src(%4 : memref<2x4x16x16xf32, #tpu.memory_space<any>>) dst(%5 : memref<2x4x16x16xf32, #tpu.memory_space<any>>)
    return
  }
}

</mosaic_0001>

<bundles_post_ra>
// kernel: tpu_custom_call.1
= control target key start
LH: loop header
LB: loop body
LE: loop exit
PB: predicated region body
PF: predicated region fallthrough
CT: control target
= control target key end

     0   :  { %s36_s6 = smov [#allocation2]   ;;  %s37_s7 = smov [#allocation3]   ;;  %s55_s0 = inlined_call_operand.hbm [shape: f32[2,4,16,16], index: 0, kind: input, shape index: {}]   ;;  %s56_s1 = inlined_call_operand.hbm [shape: f32[2,4,16,16], index: 1, kind: output, shape index: {}]  }
   0x1   :  { %s38_s8 = smov 0  }
   0x2   :  { %18 = dma.general %s55_s0, 2048, %s56_s1, %s36_s6, %s37_s7, [#allocation4], %s38_s8, 0  }
   0x3   :  { %34 = dma.done.wait [#allocation2], 2048 }
   0x4   :  { %35 = vsyncadd [#allocation2], 4294965248 }
   0x5   :  { %24 = vsyncmov [#allocation2] }
   0x8   :  { %s25_s13 = vpop.sfrf %24 }
   0x9   :  { %p30_p0 = scmp.ne.s32.totalorder %s25_s13, 0 }
   0xb   :  { %29 = shalt.err (%p30_p0)  }

</bundles_post_ra>
